<compile_context>
chip_gen: v6e
topology: v6e:2x2x1
jax: 0.10.0
libtpu: 0.0.40
codegen_flags: <defaults>
</compile_context>

<pallas_src>
import functools

import jax
import jax.numpy as jnp
import numpy as np
from jax import lax
from jax.experimental import pallas as pl
from jax.experimental.pallas import tpu as pltpu


def spatial_attention_kernel(z_ref, w1_ref, b1_ref, w2_ref, out_ref, beta_ref, *, n_valid):
    # z_ref:    (Bb, N, D)  native dtype (N padded to a multiple of 8 by the wrapper)
    # w1_ref:   (D, H)      b1_ref: (1, H)     w2_ref: (1, H)  (row layout of the (H,1) weight)
    # out_ref:  (Bb, D)     beta_ref: (Bb, N)  f32
    Bb, N, D = z_ref.shape
    H = w1_ref.shape[1]

    z = z_ref[...]                                   # keep native dtype (bf16 goes straight to MXU/VPU)

    # --- projection: one fused MXU matmul over all Bb*N rows (layout-free merge: N % 8 == 0) ---
    z2 = z.reshape(Bb * N, D)
    h = jnp.tanh(
        jnp.dot(z2, w1_ref[...], preferred_element_type=jnp.float32) + b1_ref[...]
    )                                                # (Bb*N, H) f32

    # --- H -> 1 projection as VPU multiply + lane reduce (no width-1 MXU matmul) ---
    scores = jnp.sum(h.reshape(Bb, N, H) * w2_ref[...], axis=-1)     # (Bb, N) f32

    # mask padded sequence positions (static check; no-op when N was already a multiple of 8)
    if n_valid < N:
        lane_idx = lax.broadcasted_iota(jnp.int32, (Bb, N), 1)
        scores = jnp.where(lane_idx < n_valid, scores, -jnp.inf)

    # --- softmax over the sequence axis (PyTorch dim=1); here it is the lane axis ---
    m = jnp.max(scores, axis=-1, keepdims=True)      # (Bb, 1)
    e = jnp.exp(scores - m)                          # (Bb, N)
    denom = jnp.sum(e, axis=-1, keepdims=True)       # (Bb, 1)
    beta = e / denom                                 # exact divide on a tiny (Bb, 1) tensor

    # --- weighted sum over N: VPU multiply + sublane reduce (keeps MXU free) ---
    out = jnp.sum(beta[:, :, None] * z, axis=1)      # (Bb, D) f32

    out_ref[...] = out.astype(out_ref.dtype)
    beta_ref[...] = beta.astype(beta_ref.dtype)


def _vmem_bytes_estimate(Bb, N, D, H, z_itemsize, out_itemsize):
    """Rough per-step VMEM footprint (pipeline buffers + in-kernel intermediates)."""
    z_blk = Bb * N * D * z_itemsize          # input tile
    out_blk = Bb * D * out_itemsize          # output tile
    beta_blk = Bb * N * 4                    # f32 beta tile
    wts = (D * H + 2 * H) * 4                # w1 / b1 / w2
    h_f32 = Bb * N * H * 4                   # tanh activations
    bz_f32 = Bb * N * D * 4                  # beta * z product before the sublane reduce
    # inputs/outputs are double-buffered by the pipeline
    return 2 * (z_blk + out_blk + beta_blk + wts) + h_f32 + bz_f32


def _choose_block_batch(B, N, D, H, z_itemsize, out_itemsize,
                        vmem_budget=16 * 1024 * 1024, max_rows=4096):
    """Largest divisor Bb of B whose tile fits the VMEM budget (rows capped), preferring
    sublane-dense output blocks (Bb == B or Bb % 8 == 0). No forced multi-step split."""
    divisors = sorted((d for d in range(1, B + 1) if B % d == 0), reverse=True)
    fitting = [d for d in divisors
               if d * N <= max_rows
               and _vmem_bytes_estimate(d, N, D, H, z_itemsize, out_itemsize) <= vmem_budget]
    if not fitting:
        return 1
    dense = [d for d in fitting if d == B or d % 8 == 0]
    return dense[0] if dense else fitting[0]


def spatial_attention(z, w1, b1, w2, *, block_batch=None):
    """z: (B, N, D); w1: (D, H); b1: (H,); w2: (H, 1) -> (out (B, D), beta (B, N, 1))."""
    B, N, D = z.shape
    H = w1.shape[1]

    # Pad N to a multiple of 8 so the in-kernel batch/seq merge is layout-free.
    N_pad = ((N + 7) // 8) * 8
    z_in = z if N_pad == N else jnp.pad(z, ((0, 0), (0, N_pad - N), (0, 0)))

    z_itemsize = jnp.dtype(z.dtype).itemsize
    Bb = (block_batch if block_batch is not None
          else _choose_block_batch(B, N_pad, D, H, z_itemsize, z_itemsize))
    assert B % Bb == 0, f"block_batch {Bb} must divide batch {B}"
    grid = (B // Bb,)

    est = _vmem_bytes_estimate(Bb, N_pad, D, H, z_itemsize, z_itemsize)
    # Raise the scoped-VMEM cap above v5e's 16 MiB default, stay well under v7x's 64 MiB.
    vmem_limit = int(min(max(32 * 1024 * 1024, est * 3 // 2), 56 * 1024 * 1024))

    b1_row = b1.reshape(1, H).astype(jnp.float32)
    w2_row = w2.reshape(1, H).astype(jnp.float32)    # (H, 1) -> lane-dense (1, H)

    kernel = functools.partial(spatial_attention_kernel, n_valid=N)

    out, beta = pl.pallas_call(
        kernel,
        out_shape=(
            jax.ShapeDtypeStruct((B, D), z.dtype),
            jax.ShapeDtypeStruct((B, N_pad), jnp.float32),   # lane-dense f32 beta
        ),
        grid_spec=pltpu.PrefetchScalarGridSpec(
            num_scalar_prefetch=0,
            grid=grid,
            in_specs=[
                pl.BlockSpec((Bb, N_pad, D), lambda b: (b, 0, 0)),
                pl.BlockSpec((D, H), lambda b: (0, 0)),
                pl.BlockSpec((1, H), lambda b: (0, 0)),
                pl.BlockSpec((1, H), lambda b: (0, 0)),
            ],
            out_specs=[
                pl.BlockSpec((Bb, D), lambda b: (b, 0)),
                pl.BlockSpec((Bb, N_pad), lambda b: (b, 0)),
            ],
        ),
        compiler_params=pltpu.CompilerParams(
            dimension_semantics=("arbitrary",),
            vmem_limit_bytes=vmem_limit,
        ),
    )(z_in, w1, b1_row, w2_row)

    beta = beta[:, :N]                 # strip the sequence padding
    return out, beta[..., None]        # match PyTorch: beta is (B, N, 1)


def spatial_attention_ref(z, w1, b1, w2):
    # pure-JAX reference matching the PyTorch forward
    w = jnp.tanh(jnp.einsum("bnd,dh->bnh", z, w1) + b1) @ w2        # (B, N, 1)
    beta = jax.nn.softmax(w, axis=1)
    out = jnp.sum(beta * z, axis=1)
    return out, beta


if __name__ == "__main__":
    key = jax.random.PRNGKey(0)
    B, N, D, H = 2, 8, 32, 16   # batch, seq/nodes, in_size, hidden_size

    k_z, k_w1, k_b1, k_w2 = jax.random.split(key, 4)
    z = jax.random.normal(k_z, (B, N, D), dtype=jnp.float32)

    # Deterministic parameter init (uniform, PyTorch-Linear-style bounds)
    bound1 = 1.0 / np.sqrt(D)
    w1 = jax.random.uniform(k_w1, (D, H), minval=-bound1, maxval=bound1, dtype=jnp.float32)
    b1 = jax.random.uniform(k_b1, (H,), minval=-bound1, maxval=bound1, dtype=jnp.float32)
    bound2 = 1.0 / np.sqrt(H)
    w2 = jax.random.uniform(k_w2, (H, 1), minval=-bound2, maxval=bound2, dtype=jnp.float32)

    out, beta = spatial_attention(z, w1, b1, w2)
    out = jax.block_until_ready(out)
    beta = jax.block_until_ready(beta)

    out_ref, beta_ref = spatial_attention_ref(z, w1, b1, w2)
    np.testing.assert_allclose(np.asarray(out), np.asarray(out_ref), rtol=1e-3, atol=1e-3)
    np.testing.assert_allclose(np.asarray(beta), np.asarray(beta_ref), rtol=1e-3, atol=1e-3)

    print("KERNEL_OK")
</pallas_src>

<mosaic_0001>
module attributes {stable_mosaic.version = 11 : i64} {
  func.func @spatial_attention_kernel(%arg0: i32, %arg1: memref<2x8x32xf32, #tpu.memory_space<vmem>>, %arg2: memref<32x16xf32, #tpu.memory_space<vmem>>, %arg3: memref<1x16xf32, #tpu.memory_space<vmem>>, %arg4: memref<1x16xf32, #tpu.memory_space<vmem>>, %arg5: memref<2x32xf32, #tpu.memory_space<vmem>>, %arg6: memref<2x8xf32, #tpu.memory_space<vmem>>) attributes {dimension_semantics = [#tpu.dimension_semantics<arbitrary>], iteration_bounds = array<i64: 1>, scalar_prefetch = 0 : i64, scratch_operands = 0 : i64, tpu.core_type = #tpu.core_type<tc>, window_params = [{transform_indices = @transform_0, window_bounds = array<i64: 2, 8, 32>}, {pipeline_mode = #tpu.pipeline_mode<synchronous>, transform_indices = @transform_1, window_bounds = array<i64: 32, 16>}, {pipeline_mode = #tpu.pipeline_mode<synchronous>, transform_indices = @transform_2, window_bounds = array<i64: 1, 16>}, {pipeline_mode = #tpu.pipeline_mode<synchronous>, transform_indices = @transform_3, window_bounds = array<i64: 1, 16>}, {transform_indices = @transform_4, window_bounds = array<i64: 2, 32>}, {transform_indices = @transform_5, window_bounds = array<i64: 2, 8>}]} {
    %c0 = arith.constant 0 : index
    %c0_0 = arith.constant 0 : index
    %c0_1 = arith.constant 0 : index
    %0 = vector.load %arg1[%c0, %c0_0, %c0_1] : memref<2x8x32xf32, #tpu.memory_space<vmem>>, vector<2x8x32xf32>
    %1 = vector.shape_cast %0 : vector<2x8x32xf32> to vector<16x32xf32>
    %c0_2 = arith.constant 0 : index
    %c0_3 = arith.constant 0 : index
    %2 = vector.load %arg2[%c0_2, %c0_3] : memref<32x16xf32, #tpu.memory_space<vmem>>, vector<32x16xf32>
    %cst = arith.constant dense<0.000000e+00> : vector<16x16xf32>
    %3 = tpu.matmul %1, %2, %cst {dimension_numbers = #tpu.dot_dimension_numbers<[1], [0], [0], [1], [0, 0, 1, 1], [], []>} : vector<16x32xf32>, vector<32x16xf32>, vector<16x16xf32> -> vector<16x16xf32>
    %c0_4 = arith.constant 0 : index
    %c0_5 = arith.constant 0 : index
    %4 = vector.load %arg3[%c0_4, %c0_5] : memref<1x16xf32, #tpu.memory_space<vmem>>, vector<1x16xf32>
    %5 = vector.broadcast %4 : vector<1x16xf32> to vector<16x16xf32>
    %6 = arith.addf %3, %5 : vector<16x16xf32>
    %7 = math.tanh %6 : vector<16x16xf32>
    %8 = vector.shape_cast %7 : vector<16x16xf32> to vector<2x8x16xf32>
    %c0_6 = arith.constant 0 : index
    %c0_7 = arith.constant 0 : index
    %9 = vector.load %arg4[%c0_6, %c0_7] : memref<1x16xf32, #tpu.memory_space<vmem>>, vector<1x16xf32>
    %10 = vector.shape_cast %9 : vector<1x16xf32> to vector<1x1x16xf32>
    %11 = vector.broadcast %10 : vector<1x1x16xf32> to vector<2x8x16xf32>
    %12 = arith.mulf %8, %11 : vector<2x8x16xf32>
    %cst_8 = arith.constant dense<0.000000e+00> : vector<2x8xf32>
    %13 = vector.multi_reduction <add>, %12, %cst_8 [2] : vector<2x8x16xf32> to vector<2x8xf32>
    %cst_9 = arith.constant dense<0xFF800000> : vector<2xf32>
    %14 = vector.multi_reduction <maximumf>, %13, %cst_9 [1] : vector<2x8xf32> to vector<2xf32>
    %15 = vector.shape_cast %14 : vector<2xf32> to vector<2x1xf32>
    %16 = vector.broadcast %15 : vector<2x1xf32> to vector<2x8xf32>
    %17 = arith.subf %13, %16 : vector<2x8xf32>
    %18 = math.exp %17 : vector<2x8xf32>
    %cst_10 = arith.constant dense<0.000000e+00> : vector<2xf32>
    %19 = vector.multi_reduction <add>, %18, %cst_10 [1] : vector<2x8xf32> to vector<2xf32>
    %20 = vector.shape_cast %19 : vector<2xf32> to vector<2x1xf32>
    %21 = vector.broadcast %20 : vector<2x1xf32> to vector<2x8xf32>
    %22 = arith.divf %18, %21 : vector<2x8xf32>
    %23 = vector.shape_cast %22 : vector<2x8xf32> to vector<2x8x1xf32>
    %24 = vector.broadcast %23 : vector<2x8x1xf32> to vector<2x8x32xf32>
    %25 = arith.mulf %24, %0 : vector<2x8x32xf32>
    %cst_11 = arith.constant dense<0.000000e+00> : vector<2x32xf32>
    %26 = vector.multi_reduction <add>, %25, %cst_11 [1] : vector<2x8x32xf32> to vector<2x32xf32>
    %c0_12 = arith.constant 0 : index
    %c0_13 = arith.constant 0 : index
    %27 = vector.load %arg5[%c0_12, %c0_13] : memref<2x32xf32, #tpu.memory_space<vmem>>, vector<2x32xf32>
    tpu.vector_store %arg5[%c0_12, %c0_13], %26 {strides = array<i32>} : memref<2x32xf32, #tpu.memory_space<vmem>>, vector<2x32xf32>,
    %c0_14 = arith.constant 0 : index
    %c0_15 = arith.constant 0 : index
    %28 = vector.load %arg6[%c0_14, %c0_15] : memref<2x8xf32, #tpu.memory_space<vmem>>, vector<2x8xf32>
    tpu.vector_store %arg6[%c0_14, %c0_15], %22 {strides = array<i32>} : memref<2x8xf32, #tpu.memory_space<vmem>>, vector<2x8xf32>,
    return
  }
  func.func @transform_0(%arg0: i32) -> (i32, i32, i32) {
    %c0_i32 = arith.constant 0 : i32
    %c0_i32_0 = arith.constant 0 : i32
    %c0_i32_1 = arith.constant 0 : i32
    return %arg0, %c0_i32, %c0_i32_0 : i32, i32, i32
  }
  func.func @transform_1(%arg0: i32) -> (i32, i32) {
    %c0_i32 = arith.constant 0 : i32
    %c0_i32_0 = arith.constant 0 : i32
    %c0_i32_1 = arith.constant 0 : i32
    return %c0_i32, %c0_i32_0 : i32, i32
  }
  func.func @transform_2(%arg0: i32) -> (i32, i32) {
    %c0_i32 = arith.constant 0 : i32
    %c0_i32_0 = arith.constant 0 : i32
    %c0_i32_1 = arith.constant 0 : i32
    return %c0_i32, %c0_i32_0 : i32, i32
  }
  func.func @transform_3(%arg0: i32) -> (i32, i32) {
    %c0_i32 = arith.constant 0 : i32
    %c0_i32_0 = arith.constant 0 : i32
    %c0_i32_1 = arith.constant 0 : i32
    return %c0_i32, %c0_i32_0 : i32, i32
  }
  func.func @transform_4(%arg0: i32) -> (i32, i32) {
    %c0_i32 = arith.constant 0 : i32
    %c0_i32_0 = arith.constant 0 : i32
    return %arg0, %c0_i32 : i32, i32
  }
  func.func @transform_5(%arg0: i32) -> (i32, i32) {
    %c0_i32 = arith.constant 0 : i32
    %c0_i32_0 = arith.constant 0 : i32
    return %arg0, %c0_i32 : i32, i32
  }
}

</mosaic_0001>

<bundles_post_ra>
// kernel: tpu_custom_call.1
= control target key start
LH: loop header
LB: loop body
LE: loop exit
PB: predicated region body
PF: predicated region fallthrough
CT: control target
= control target key end

     0   :  { %11 = vsyncpa [#allocation3], 0  ;;  %vm34_vm0 = vcmask 261120   ;;  %s441_s0 = inlined_call_operand.vmem [shape: f32[2,8,32], index: 0, kind: input, shape index: {}]   ;;  %s442_s1 = inlined_call_operand.vmem [shape: f32[32,16], index: 1, kind: input, shape index: {}]   ;;  %s443_s2 = inlined_call_operand.vmem [shape: f32[1,16], index: 2, kind: input, shape index: {}]   ;;  %s444_s3 = inlined_call_operand.vmem [shape: f32[1,16], index: 3, kind: input, shape index: {}]   ;;  %s445_s4 = inlined_call_operand.hbm [shape: f32[2,32], index: 4, kind: output, shape index: {0}]   ;;  %s446_s5 = inlined_call_operand.hbm [shape: f32[2,8], index: 5, kind: output, shape index: {1}]  }
   0x1   :  { %v26_v0 = vld [vmem:[%s442_s1 + $0x18] sm:$0xff]  ;;  %v25_v1 = vld [vmem:[%s442_s1 + $0x10] sm:$0xff]  ;;  %v401_v2 = vld [vmem:[%s441_s0] sm:$0xff] }
   0x2   :  { %287 = vmatprep.subr.mxu0 %v26_v0  ;;  %v24_v3 = vld [vmem:[%s442_s1 + $0x8] sm:$0xff]  ;;  %295 = vmatprep.mubr.msk.f32.mxu0 %vm34_vm0, %v401_v2 }
   0x3   :  { %288 = vmatpush3.msra.mxu0 %v26_v0 }
   0x4   :  { %12 = vsyncpa [#allocation5], 0  ;;  %289 = vmatprep.subr.mxu0 %v25_v1  ;;  %v23_v4 = vld [vmem:[%s442_s1] sm:$0xff]  ;;  %v414_v5 = vld [vmem:[%s441_s0 + $0x8] sm:$0xff]  ;;  %vm127_vm1 = vcmask 130048   ;;  %v136_v18 = vlaneseq  ;;  %vm146_vm2 = vcmask 1041409  }
   0x5   :  { %290 = vmatpush3.msra.mxu0 %v25_v1  ;;  %v277_v6 = vld [vmem:[%s443_s2] ss:$0 sm:$0xff]  ;;  %vm149_vm3 = vcmask 58368   ;;  %v359_v28 = vmov 0   ;;  %s360_s2 = smov [#allocation4]  }
   0x6   :  { %291 = vmatprep.subr.mxu0 %v24_v3  ;;  %v280_v13 = vld [vmem:[%s444_s3] ss:$0 sm:$0xff]  ;;  %v137_v19 = vand.u32 127, %v136_v18  ;;  %v139_v20 = vshrl.u32 %v136_v18, 7  ;;  %302 = vset.pattern.permute.xlu0 %v359_v28  ;;  %s265_s3 = sshll.u32 %s360_s2, 4  ;;  %s266_s3 = int_to_ptr.vmem [resolvable:$true] %s265_s3 }
   0x7   :  { %292 = vmatpush3.msra.mxu0 %v24_v3  ;;  %301 = vset.pattern.permute.xlu1 %v359_v28  ;;  %s315_s7 = scalar_lea.vmem %s266_s3, 32  ;;  %p320_p1 = scmp.lt.s32.totalorder %s266_s3, %s266_s3 }
   0x8   :  { %293 = vmatprep.subr.mxu0 %v23_v4  ;;  %v140_v22 = vsub.s32 %v137_v19, %v139_v20  ;;  %v156_v29 = vsub.s32 0, %v139_v20  ;;  %v160_v30 = vsub.s32 1, %v139_v20  ;;  %p316_p0 = scmp.ne.s32.totalorder %s266_s3, %s315_s7  ;;  %p321_p2 = scmp.lt.s32.totalorder %s315_s7, %s315_s7 }
   0x9   :  { %294 = vmatpush3.msra.mxu0 %v23_v4 }
   0xa   :  { %296 = vmatmul.mubr.msk.f32.vlgmr.msra.gmra.mxu0 %vm34_vm0, %v414_v5  ;;  %p322_p3 = por %p321_p2, %p320_p1 }
   0xc   :  { %p323_p4 = pnand %p322_p3, %p316_p0 }
  0xca   :  { %v297_v7 = vpop.f32.mrf.mxu0 }
  0xcb   :  { %v113_v8 = vadd.f32 %v297_v7, %v277_v6 }
  0xcc   :  { %v107_v9 = vpop.f32.mrf.mxu0 }
  0xcd   :  { %v108_v10 = vadd.f32 %v277_v6, %v107_v9  ;;  %303 = vtanh.f32 %v113_v8 }
  0xcf   :  { %305 = vtanh.f32 %v108_v10 }
  0xda   :  { %v304_v11 = vpop.eup %303 }
  0xdb   :  { %v126_v16 = vmul.f32 %v304_v11, %v280_v13 }
  0xdc   :  { %v306_v12 = vpop.eup %305 }
  0xdd   :  { %v125_v14 = vmul.f32 %v306_v12, %v280_v13  ;;  %v131_v17 = vsel %vm127_vm1, %v126_v16, 0.0 }
  0xdf   :  { %v128_v15 = vsel %vm127_vm1, %v125_v14, 0.0 }
  0xe0   :  { %129 = vadd.xlane.f32.xlu0 %v128_v15 }
  0xe4   :  { %132 = vadd.xlane.f32.xlu0 %v131_v17 }
 0x169   :  { %v130_v21 = vpop.xlane.xlu0 %129 }
 0x16a   :  { %v141_v24 = vrot.slane %v130_v21, %v140_v22 }
 0x16d   :  { %v133_v23 = vpop.xlane.xlu0 %132 }
 0x16e   :  { %v145_v25 = vrot.slane %v133_v23, %v140_v22 }
 0x170   :  { %v147_v26 = vsel %vm146_vm2, %v145_v25, %v141_v24 }
 0x171   :  { %v150_v27 = vsel %vm149_vm3, %v147_v26, -inf }
 0x172   :  { %151 = vmax.xlane.f32.xlu1 %v150_v27 }
 0x1fb   :  { %v152_v31 = vpop.xlane.xlu1 %151 }
 0x1fc   :  { %v157_v32 = vrot.slane %v152_v31, %v156_v29  ;;  %v161_v33 = vrot.slane %v152_v31, %v160_v30 }
 0x1fe   :  { %v164_v34 = vsub.f32 %v130_v21, %v157_v32  ;;  %v165_v35 = vsub.f32 %v133_v23, %v161_v33 }
 0x200   :  { %v166_v36 = vmul.f32 1.442695, %v164_v34  ;;  %v168_v37 = vmul.f32 1.442695, %v165_v35 }
 0x202   :  { %307 = vpow2.f32 %v166_v36 }
 0x203   :  { %309 = vpow2.f32 %v168_v37 }
 0x20f   :  { %v308_v38 = vpop.eup %307 }
 0x210   :  { %v310_v39 = vpop.eup %309  ;;  %173 = vperm.xlu1 %301, %v308_v38  }
 0x211   :  { %176 = vperm.xlu0 %302, %v310_v39  }
 0x28b   :  { %v174_v40 = vpop.permute.xlu1 %173 }
 0x28c   :  { %v177_v41 = vpop.permute.xlu0 %176  ;;  %v181_v42 = vrot.slane %v174_v40, %v140_v22 }
 0x28d   :  { %v185_v43 = vrot.slane %v177_v41, %v140_v22 }
 0x28f   :  { %v186_v44 = vsel %vm146_vm2, %v185_v43, %v181_v42 }
 0x290   :  { %v188_v45 = vsel %vm149_vm3, %v186_v44, 0.0 }
 0x291   :  { %189 = vadd.xlane.f32.xlu1 %v188_v45 }
 0x31a   :  { %v190_v46 = vpop.xlane.xlu1 %189 }
 0x31b   :  { %v195_v47 = vrot.slane %v190_v46, %v156_v29  ;;  %v199_v48 = vrot.slane %v190_v46, %v160_v30 }
 0x31d   :  { %311 = vrcp.f32 %v195_v47 }
 0x31e   :  { %313 = vrcp.f32 %v199_v48 }
 0x32a   :  { %v312_v49 = vpop.eup %311 }
 0x32b   :  { %v203_v50 = vmul.f32 %v312_v49, %v308_v38  ;;  %v314_v51 = vpop.eup %313 }
 0x32c   :  { %v205_v52 = vmul.f32 %v314_v51, %v310_v39 }
 0x32d   :  { %208 = vperm.xlu0 %302, %v203_v50  }
 0x331   :  { %213 = vperm.xlu0 %302, %v205_v52  }
 0x3a8   :  { %v209_v53 = vpop.permute.xlu0 %208 }
 0x3a9   :  { %v216_v54 = vmul.f32 %v209_v53, %v401_v2  ;;  %v241_v58 = vrot.slane %v209_v53, %v140_v22 }
 0x3ab   :  { %v218_v55 = vsel %vm34_vm0, %v216_v54, 0.0 }
 0x3ac   :  { %v219_v56 = vrot.slane %v218_v55, 4  ;;  %v214_v57 = vpop.permute.xlu0 %213 }
 0x3ad   :  { %v217_v59 = vmul.f32 %v214_v57, %v414_v5  ;;  %v245_v60 = vrot.slane %v214_v57, %v140_v22 }
 0x3ae   :  { %v220_v61 = vadd.f32 %v219_v56, %v218_v55 }
 0x3af   :  { %v225_v62 = vsel %vm34_vm0, %v217_v59, 0.0  ;;  %v246_v63 = vsel %vm146_vm2, %v245_v60, %v241_v58 }
 0x3b0   :  { %v221_v0 = vrot.slane %v220_v61, 2  ;;  %v226_v1 = vrot.slane %v225_v62, 4  ;;  %248 = vst.msk [vmem:[#allocation4] sm:$0x3] %vm149_vm3, %v246_v63 }
 0x3b1   :  { %326 = shalt.err (!%p323_p4)
}
 0x3b2   :  { %268 = dma.vmem_to_hbm [thread:$0]  %s266_s3, 32, %s446_s5, [#allocation5]   ;;  %v222_v2 = vadd.f32 %v221_v0, %v220_v61  ;;  %v227_v3 = vadd.f32 %v226_v1, %v225_v62  ;;  %vm236_vm4 = vcmask 254976  }
 0x3b3   :  { %s361_s10 = smov [#allocation2]  }
 0x3b4   :  { %v228_v4 = vrot.slane %v227_v3, 2  ;;  %v223_v6 = vrot.slane %v222_v2, 1  ;;  %s255_s11 = sshll.u32 %s361_s10, 4  ;;  %s256_s11 = int_to_ptr.vmem [resolvable:$true] %s255_s11 }
 0x3b5   :  { %s335_s12 = scalar_lea.vmem %s256_s11, 32  ;;  %p340_p6 = scmp.lt.s32.totalorder %s256_s11, %s256_s11 }
 0x3b6   :  { %v229_v5 = vadd.f32 %v228_v4, %v227_v3  ;;  %v224_v8 = vadd.f32 %v223_v6, %v222_v2  ;;  %p336_p5 = scmp.ne.s32.totalorder %s256_s11, %s335_s12  ;;  %p341_p7 = scmp.lt.s32.totalorder %s335_s12, %s335_s12 }
 0x3b8   :  { %v230_v7 = vrot.slane %v229_v5, 1  ;;  %p342_p8 = por %p341_p7, %p340_p6 }
 0x3ba   :  { %v231_v9 = vadd.f32 %v230_v7, %v229_v5  ;;  %p343_p9 = pnand %p342_p8, %p336_p5 }
 0x3bc   :  { %v234_v10 = vsel %vm146_vm2, %v231_v9, %v224_v8 }
 0x3bd   :  { %237 = vst.msk [vmem:[#allocation2] sm:$0x3] %vm236_vm4, %v234_v10 }
 0x3be   :  { %346 = shalt.err (!%p343_p9)
}
 0x3bf   :  { %258 = dma.vmem_to_hbm [thread:$0]  %s256_s11, 32, %s445_s4, [#allocation3]  }
 0x3c0   :  { %355 = dma.done.wait [#allocation3], 32  }
 0x3c1   :  { %356 = vsyncadd [#allocation3], 4294967264 }
 0x3c2   :  { %357 = dma.done.wait [#allocation5], 32  }
 0x3c3   :  { %358 = vsyncadd [#allocation5], 4294967264 }
 0x3c4   :  { %275 = vsyncpa [#allocation3], 1 }
 0x3c5   :  { %276 = vsyncpa [#allocation5], 1 }

</bundles_post_ra>
